<compile_context>
chip_gen: v5e
topology: v5e:2x2
jax: 0.10.0
libtpu: 0.0.40
codegen_flags: <defaults>
</compile_context>

<pallas_src>
import jax
import jax.numpy as jnp
import numpy as np
from jax.experimental import pallas as pl
from jax.experimental.pallas import tpu as pltpu

# Model hyper-parameters (small, consistent with the module's forward)
INPUT_SIZE = 1
HIDDEN = 32
OUTPUT_SIZE = 1
GRID_H = 2
GRID_W = 4
NCELLS = GRID_H * GRID_W
BATCH = 128

# MXU operand dtype.  Set to jnp.bfloat16 on v6e/v7x for guaranteed single-pass MXU
# issue (accumulation stays f32 via preferred_element_type); f32 by default so the
# correctness check stays tight.
MXU_DTYPE = jnp.float32


# ----------------------------------------------------------------------------------
# Static wavefront structure (anti-diagonals of the GRID_H x GRID_W lattice).
# ----------------------------------------------------------------------------------
def _diag_cells():
    diags = []
    for d in range(GRID_H + GRID_W - 1):
        cells = [(i, d - i) for i in range(GRID_H) if 0 <= d - i < GRID_W]
        diags.append(cells)
    return diags


DIAG_CELLS = _diag_cells()                      # e.g. [[(0,0)],[(0,1),(1,0)],...]
DIAG_SIZES = [len(c) for c in DIAG_CELLS]       # [1,2,2,2,1] for 2x4
NDIAG = len(DIAG_CELLS)
DIAG_PERM = np.array([i * GRID_W + j for cells in DIAG_CELLS for (i, j) in cells],
                     np.int32)                  # cell indices in diagonal order


# ----------------------------------------------------------------------------------
# Kernel
# ----------------------------------------------------------------------------------
def make_lattice_kernel(diag_sizes):
    """Kernel factory: one dot + one tanh per anti-diagonal, one fused head dot."""
    ndiag = len(diag_sizes)
    ndots = ndiag - 1
    offs = [0]
    for s in diag_sizes:
        offs.append(offs[-1] + s * HIDDEN)      # static sublane offsets (32-aligned)

    def kernel(*refs):
        pre0_ref = refs[0]                      # (NCELLS*H, TB) input+bias pre-acts
        wdiag_refs = refs[1:1 + ndots]          # per-diagonal block weights
        whead_ref = refs[1 + ndots]             # (H+1, H) fused [fc_hidden; fc_out]
        bhead_ref = refs[2 + ndots]             # (H+1, 1)
        out_ref = refs[3 + ndots]               # (H+1, TB)

        h_prev = None                           # stacked hiddens of previous diagonal
        for d in range(ndiag):
            lo, hi = offs[d], offs[d + 1]
            pre = pre0_ref[lo:hi, :]            # static sublane slice (free)
            if d > 0:
                w = wdiag_refs[d - 1][...]
                pre = pre + jnp.dot(w, h_prev.astype(w.dtype),
                                    preferred_element_type=jnp.float32)
            h_prev = jnp.tanh(pre)              # one tanh barrier per diagonal

        # Last diagonal holds exactly the bottom-right cell -> fused head.
        wh = whead_ref[...]
        head = (jnp.dot(wh, h_prev.astype(wh.dtype),
                        preferred_element_type=jnp.float32)
                + bhead_ref[...])               # (H+1, TB)
        row = jax.lax.broadcasted_iota(jnp.int32, head.shape, 0)
        out_ref[...] = jnp.where(row == HIDDEN, jax.nn.sigmoid(head), head)

    return kernel


# ----------------------------------------------------------------------------------
# Parameters
# ----------------------------------------------------------------------------------
def make_params(key):
    """Deterministic synthetic parameters in 'y = x @ W + b' form."""
    ks = jax.random.split(key, 13)
    scale = 0.1
    return dict(
        wd=jax.random.normal(ks[0], (NCELLS, 2 * HIDDEN, HIDDEN), jnp.float32) * scale,
        bd=jax.random.normal(ks[1], (NCELLS, HIDDEN), jnp.float32) * scale,
        ws=jax.random.normal(ks[2], (NCELLS, HIDDEN, HIDDEN), jnp.float32) * scale,
        bs=jax.random.normal(ks[3], (NCELLS, HIDDEN), jnp.float32) * scale,
        wih=jax.random.normal(ks[4], (NCELLS, HIDDEN), jnp.float32) * scale,
        bih=jax.random.normal(ks[5], (NCELLS, HIDDEN), jnp.float32) * scale,
        whh=jax.random.normal(ks[6], (NCELLS, HIDDEN, HIDDEN), jnp.float32) * scale,
        bhh=jax.random.normal(ks[7], (NCELLS, HIDDEN), jnp.float32) * scale,
        wfh=jax.random.normal(ks[8], (HIDDEN, HIDDEN), jnp.float32) * scale,
        bfh=jax.random.normal(ks[9], (1, HIDDEN), jnp.float32) * scale,
        wout=jax.random.normal(ks[10], (HIDDEN, OUTPUT_SIZE), jnp.float32) * scale,
        bout=jax.random.normal(ks[11], (1, OUTPUT_SIZE), jnp.float32) * scale,
    )


def pack_params(p, *, mxu_dtype=jnp.float32):
    """Host-side (numpy) algebraic folding + per-diagonal block-weight packing.

    Runs ONCE per model (hoisted out of the per-call path).
    """
    H = HIDDEN
    wd = np.asarray(p["wd"]); bd = np.asarray(p["bd"])
    ws = np.asarray(p["ws"]); bs = np.asarray(p["bs"])
    wih = np.asarray(p["wih"]); bih = np.asarray(p["bih"])
    whh = np.asarray(p["whh"]); bhh = np.asarray(p["bhh"])

    pos_in_diag = {}
    for cells in DIAG_CELLS:
        for r, ij in enumerate(cells):
            pos_in_diag[ij] = r

    # Input weight + folded bias, stacked in DIAGONAL order.
    flat_cells = [ij for cells in DIAG_CELLS for ij in cells]
    wih_diag = np.zeros((NCELLS, H), np.float32)
    beff_diag = np.zeros((NCELLS, H), np.float32)
    for k, (i, j) in enumerate(flat_cells):
        c = i * GRID_W + j
        base = bih[c] + bhh[c]
        if i > 0 and j > 0:                      # double-hidden cell
            beff = bd[c] @ whh[c] + base
        elif i > 0 or j > 0:                     # single-hidden cell
            beff = bs[c] @ whh[c] + base
        else:                                    # cell (0,0): zero hidden
            beff = base
        wih_diag[k] = wih[c]
        beff_diag[k] = beff

    # Per-diagonal block weights (folded through whh, pre-transposed, zeros where
    # no lattice edge exists).
    wdiag = []
    for d in range(1, NDIAG):
        curr, prev = DIAG_CELLS[d], DIAG_CELLS[d - 1]
        W = np.zeros((len(curr) * H, len(prev) * H), np.float32)
        for r, (i, j) in enumerate(curr):
            c = i * GRID_W + j
            rl, rh = r * H, (r + 1) * H
            if i > 0 and j > 0:                  # left uses wd[:H], up uses wd[H:]
                pL = pos_in_diag[(i, j - 1)]
                pU = pos_in_diag[(i - 1, j)]
                W[rl:rh, pL * H:(pL + 1) * H] = (wd[c][:H] @ whh[c]).T
                W[rl:rh, pU * H:(pU + 1) * H] = (wd[c][H:] @ whh[c]).T
            elif j > 0:                          # single: hidden_left
                pL = pos_in_diag[(i, j - 1)]
                W[rl:rh, pL * H:(pL + 1) * H] = (ws[c] @ whh[c]).T
            else:                                # single: hidden_up (j == 0, i > 0)
                pU = pos_in_diag[(i - 1, j)]
                W[rl:rh, pU * H:(pU + 1) * H] = (ws[c] @ whh[c]).T
        wdiag.append(jnp.asarray(W, mxu_dtype))

    wfh = np.asarray(p["wfh"]); bfh = np.asarray(p["bfh"])
    wout = np.asarray(p["wout"]); bout = np.asarray(p["bout"])
    whead = np.concatenate([wfh.T, wout.T], axis=0)                        # (H+1, H)
    bhead = np.concatenate([bfh.reshape(H, 1), bout.reshape(1, 1)], 0)     # (H+1, 1)

    return dict(
        wih_diag=jnp.asarray(wih_diag),          # (NCELLS, H)  diag order
        beff_diag=jnp.asarray(beff_diag),        # (NCELLS, H)  diag order
        wdiag=tuple(wdiag),                      # per-diagonal block weights
        whead=jnp.asarray(whead, mxu_dtype),
        bhead=jnp.asarray(bhead, jnp.float32),
    )


# ----------------------------------------------------------------------------------
# Forward
# ----------------------------------------------------------------------------------
def _default_num_batch_tiles(batch):
    """Grow the lane tile instead of adding grid steps (each step ~0.35us and
    re-runs the same serial chain); only split the batch above 2048 lanes."""
    if batch <= 2048 or batch % 128 != 0:
        return 1
    tiles = (batch + 2047) // 2048
    while batch % tiles != 0 or (batch // tiles) % 128 != 0:
        tiles += 1
    return tiles


def lattice_rnn_forward(x, hidden_ext, packed, *, num_batch_tiles=None):
    """x: (batch, seq, input_size). hidden_ext is dead code in the original module."""
    del hidden_ext  # unused: overwritten before use in the PyTorch forward
    B, S, I = x.shape
    assert S * I == NCELLS
    if num_batch_tiles is None:
        num_batch_tiles = _default_num_batch_tiles(B)
    assert B % num_batch_tiles == 0
    tb = B // num_batch_tiles
    assert num_batch_tiles == 1 or tb % 128 == 0, "batch tiles must stay lane-dense"

    # Hoisted rank-1 input term: one batched elementwise op -> lane-dense slab,
    # cells stacked along sublanes in diagonal order.  Batch lives on lanes.
    x2 = x.reshape(B, NCELLS).astype(jnp.float32)
    x_diag = jnp.take(x2, jnp.asarray(DIAG_PERM), axis=1)            # (B, NCELLS)
    pre0 = (packed["wih_diag"][:, :, None] * x_diag.T[:, None, :]
            + packed["beff_diag"][:, :, None]).reshape(NCELLS * HIDDEN, B)

    wdiag = packed["wdiag"]
    kernel = make_lattice_kernel(DIAG_SIZES)

    in_specs = ([pl.BlockSpec((NCELLS * HIDDEN, tb), lambda b: (0, b))]
                + [pl.BlockSpec(w.shape, lambda b: (0, 0)) for w in wdiag]
                + [pl.BlockSpec(packed["whead"].shape, lambda b: (0, 0)),
                   pl.BlockSpec(packed["bhead"].shape, lambda b: (0, 0))])
    out_specs = pl.BlockSpec((HIDDEN + 1, tb), lambda b: (0, b))

    head = pl.pallas_call(
        kernel,
        out_shape=jax.ShapeDtypeStruct((HIDDEN + 1, B), jnp.float32),
        grid_spec=pltpu.PrefetchScalarGridSpec(
            num_scalar_prefetch=0,
            grid=(num_batch_tiles,),
            in_specs=in_specs,
            out_specs=out_specs,
        ),
        compiler_params=pltpu.CompilerParams(
            dimension_semantics=(
                ("parallel",) if num_batch_tiles > 1 else ("arbitrary",))),
    )(pre0, *wdiag, packed["whead"], packed["bhead"])

    hid = head[:HIDDEN, :].T                 # (B, HIDDEN)  fc_hidden output
    out = head[HIDDEN:HIDDEN + 1, :].T       # (B, 1)       sigmoid(fc_out)
    return out, hid


# ----------------------------------------------------------------------------------
# Pure-JAX reference mirroring the PyTorch forward (unfolded math)
# ----------------------------------------------------------------------------------
def lattice_rnn_reference(x, params):
    B, S, I = x.shape
    x2 = x.reshape(B, NCELLS).astype(jnp.float32)
    prev_row = [None] * GRID_W
    for i in range(GRID_H):
        hl = None
        for j in range(GRID_W):
            c = i * GRID_W + j
            hu = prev_row[j] if i > 0 else None
            if (hl is not None) and (hu is not None):
                comb = jnp.concatenate([hl, hu], axis=1)
                hidden = comb @ params["wd"][c] + params["bd"][c]
            elif hl is not None:
                hidden = hl @ params["ws"][c] + params["bs"][c]
            elif hu is not None:
                hidden = hu @ params["ws"][c] + params["bs"][c]
            else:
                hidden = jnp.zeros((B, HIDDEN), jnp.float32)
            xb = x2[:, c:c + 1]
            h = jnp.tanh(xb * params["wih"][c][None, :] + params["bih"][c]
                         + hidden @ params["whh"][c] + params["bhh"][c])
            prev_row[j] = h
            hl = h
    h_br = prev_row[GRID_W - 1]
    hid = h_br @ params["wfh"] + params["bfh"]
    out = jax.nn.sigmoid(h_br @ params["wout"] + params["bout"])
    return out, hid


if __name__ == "__main__":
    key = jax.random.PRNGKey(0)
    kx, kh, kp = jax.random.split(key, 3)

    x = jax.random.normal(kx, (BATCH, NCELLS, INPUT_SIZE), jnp.float32)
    hidden_ext = jax.random.normal(kh, (BATCH, HIDDEN), jnp.float32)  # dead input
    params = make_params(kp)

    packed = pack_params(params, mxu_dtype=MXU_DTYPE)   # once per model (hoisted)
    fwd = jax.jit(lattice_rnn_forward)

    out, hid = fwd(x, hidden_ext, packed)
    jax.block_until_ready((out, hid))

    out_ref, hid_ref = lattice_rnn_reference(x, params)
    assert out.shape == (BATCH, OUTPUT_SIZE) and hid.shape == (BATCH, HIDDEN)
    np.testing.assert_allclose(np.asarray(out), np.asarray(out_ref),
                               rtol=1e-2, atol=1e-2)
    np.testing.assert_allclose(np.asarray(hid), np.asarray(hid_ref),
                               rtol=1e-2, atol=1e-2)

    print("KERNEL_OK")
</pallas_src>

<mosaic_0001>
module attributes {stable_mosaic.version = 11 : i64} {
  func.func @kernel(%arg0: i32, %arg1: memref<256x128xf32, #tpu.memory_space<vmem>>, %arg2: memref<64x32xf32, #tpu.memory_space<vmem>>, %arg3: memref<64x64xf32, #tpu.memory_space<vmem>>, %arg4: memref<64x64xf32, #tpu.memory_space<vmem>>, %arg5: memref<32x64xf32, #tpu.memory_space<vmem>>, %arg6: memref<33x32xf32, #tpu.memory_space<vmem>>, %arg7: memref<33x1xf32, #tpu.memory_space<vmem>>, %arg8: memref<33x128xf32, #tpu.memory_space<vmem>>) attributes {dimension_semantics = [#tpu.dimension_semantics<arbitrary>], iteration_bounds = array<i64: 1>, scalar_prefetch = 0 : i64, scratch_operands = 0 : i64, tpu.core_type = #tpu.core_type<tc>, window_params = [{transform_indices = @transform_0, window_bounds = array<i64: 256, 128>}, {pipeline_mode = #tpu.pipeline_mode<synchronous>, transform_indices = @transform_1, window_bounds = array<i64: 64, 32>}, {pipeline_mode = #tpu.pipeline_mode<synchronous>, transform_indices = @transform_2, window_bounds = array<i64: 64, 64>}, {pipeline_mode = #tpu.pipeline_mode<synchronous>, transform_indices = @transform_3, window_bounds = array<i64: 64, 64>}, {pipeline_mode = #tpu.pipeline_mode<synchronous>, transform_indices = @transform_4, window_bounds = array<i64: 32, 64>}, {pipeline_mode = #tpu.pipeline_mode<synchronous>, transform_indices = @transform_5, window_bounds = array<i64: 33, 32>}, {pipeline_mode = #tpu.pipeline_mode<synchronous>, transform_indices = @transform_6, window_bounds = array<i64: 33, 1>}, {transform_indices = @transform_7, window_bounds = array<i64: 33, 128>}]} {
    %c0 = arith.constant 0 : index
    %c0_0 = arith.constant 0 : index
    %0 = vector.load %arg1[%c0, %c0_0] : memref<256x128xf32, #tpu.memory_space<vmem>>, vector<32x128xf32>
    %1 = math.tanh %0 : vector<32x128xf32>
    %c32 = arith.constant 32 : index
    %c0_1 = arith.constant 0 : index
    %2 = vector.load %arg1[%c32, %c0_1] : memref<256x128xf32, #tpu.memory_space<vmem>>, vector<64x128xf32>
    %c0_2 = arith.constant 0 : index
    %c0_3 = arith.constant 0 : index
    %3 = vector.load %arg2[%c0_2, %c0_3] : memref<64x32xf32, #tpu.memory_space<vmem>>, vector<64x32xf32>
    %cst = arith.constant dense<0.000000e+00> : vector<64x128xf32>
    %4 = tpu.matmul %3, %1, %cst {dimension_numbers = #tpu.dot_dimension_numbers<[1], [0], [0], [1], [0, 0, 1, 1], [], []>} : vector<64x32xf32>, vector<32x128xf32>, vector<64x128xf32> -> vector<64x128xf32>
    %5 = arith.addf %2, %4 : vector<64x128xf32>
    %6 = math.tanh %5 : vector<64x128xf32>
    %c96 = arith.constant 96 : index
    %c0_4 = arith.constant 0 : index
    %7 = vector.load %arg1[%c96, %c0_4] : memref<256x128xf32, #tpu.memory_space<vmem>>, vector<64x128xf32>
    %c0_5 = arith.constant 0 : index
    %c0_6 = arith.constant 0 : index
    %8 = vector.load %arg3[%c0_5, %c0_6] : memref<64x64xf32, #tpu.memory_space<vmem>>, vector<64x64xf32>
    %cst_7 = arith.constant dense<0.000000e+00> : vector<64x128xf32>
    %9 = tpu.matmul %8, %6, %cst_7 {dimension_numbers = #tpu.dot_dimension_numbers<[1], [0], [0], [1], [0, 0, 1, 1], [], []>} : vector<64x64xf32>, vector<64x128xf32>, vector<64x128xf32> -> vector<64x128xf32>
    %10 = arith.addf %7, %9 : vector<64x128xf32>
    %11 = math.tanh %10 : vector<64x128xf32>
    %c160 = arith.constant 160 : index
    %c0_8 = arith.constant 0 : index
    %12 = vector.load %arg1[%c160, %c0_8] : memref<256x128xf32, #tpu.memory_space<vmem>>, vector<64x128xf32>
    %c0_9 = arith.constant 0 : index
    %c0_10 = arith.constant 0 : index
    %13 = vector.load %arg4[%c0_9, %c0_10] : memref<64x64xf32, #tpu.memory_space<vmem>>, vector<64x64xf32>
    %cst_11 = arith.constant dense<0.000000e+00> : vector<64x128xf32>
    %14 = tpu.matmul %13, %11, %cst_11 {dimension_numbers = #tpu.dot_dimension_numbers<[1], [0], [0], [1], [0, 0, 1, 1], [], []>} : vector<64x64xf32>, vector<64x128xf32>, vector<64x128xf32> -> vector<64x128xf32>
    %15 = arith.addf %12, %14 : vector<64x128xf32>
    %16 = math.tanh %15 : vector<64x128xf32>
    %c224 = arith.constant 224 : index
    %c0_12 = arith.constant 0 : index
    %17 = vector.load %arg1[%c224, %c0_12] : memref<256x128xf32, #tpu.memory_space<vmem>>, vector<32x128xf32>
    %c0_13 = arith.constant 0 : index
    %c0_14 = arith.constant 0 : index
    %18 = vector.load %arg5[%c0_13, %c0_14] : memref<32x64xf32, #tpu.memory_space<vmem>>, vector<32x64xf32>
    %cst_15 = arith.constant dense<0.000000e+00> : vector<32x128xf32>
    %19 = tpu.matmul %18, %16, %cst_15 {dimension_numbers = #tpu.dot_dimension_numbers<[1], [0], [0], [1], [0, 0, 1, 1], [], []>} : vector<32x64xf32>, vector<64x128xf32>, vector<32x128xf32> -> vector<32x128xf32>
    %20 = arith.addf %17, %19 : vector<32x128xf32>
    %21 = math.tanh %20 : vector<32x128xf32>
    %c0_16 = arith.constant 0 : index
    %c0_17 = arith.constant 0 : index
    %22 = vector.load %arg6[%c0_16, %c0_17] : memref<33x32xf32, #tpu.memory_space<vmem>>, vector<33x32xf32>
    %cst_18 = arith.constant dense<0.000000e+00> : vector<33x128xf32>
    %23 = tpu.matmul %22, %21, %cst_18 {dimension_numbers = #tpu.dot_dimension_numbers<[1], [0], [0], [1], [0, 0, 1, 1], [], []>} : vector<33x32xf32>, vector<32x128xf32>, vector<33x128xf32> -> vector<33x128xf32>
    %c0_19 = arith.constant 0 : index
    %c0_20 = arith.constant 0 : index
    %24 = vector.load %arg7[%c0_19, %c0_20] : memref<33x1xf32, #tpu.memory_space<vmem>>, vector<33x1xf32>
    %25 = vector.broadcast %24 : vector<33x1xf32> to vector<33x128xf32>
    %26 = arith.addf %23, %25 : vector<33x128xf32>
    %27 = tpu.iota {dimensions = array<i32: 0>} : vector<33x128xi32>
    %c32_i32 = arith.constant 32 : i32
    %28 = vector.broadcast %c32_i32 : i32 to vector<33x128xi32>
    %29 = arith.cmpi eq, %27, %28 : vector<33x128xi32>
    %30 = arith.negf %26 : vector<33x128xf32>
    %31 = math.exp %30 : vector<33x128xf32>
    %cst_21 = arith.constant 1.000000e+00 : f32
    %32 = vector.broadcast %cst_21 : f32 to vector<33x128xf32>
    %33 = arith.addf %32, %31 : vector<33x128xf32>
    %34 = arith.divf %32, %33 : vector<33x128xf32>
    %35 = arith.select %29, %34, %26 : vector<33x128xi1>, vector<33x128xf32>
    %c0_22 = arith.constant 0 : index
    %c0_23 = arith.constant 0 : index
    %36 = vector.load %arg8[%c0_22, %c0_23] : memref<33x128xf32, #tpu.memory_space<vmem>>, vector<33x128xf32>
    tpu.vector_store %arg8[%c0_22, %c0_23], %35 {strides = array<i32>} : memref<33x128xf32, #tpu.memory_space<vmem>>, vector<33x128xf32>,
    return
  }
  func.func @transform_0(%arg0: i32) -> (i32, i32) {
    %c0_i32 = arith.constant 0 : i32
    %c0_i32_0 = arith.constant 0 : i32
    return %c0_i32, %arg0 : i32, i32
  }
  func.func @transform_1(%arg0: i32) -> (i32, i32) {
    %c0_i32 = arith.constant 0 : i32
    %c0_i32_0 = arith.constant 0 : i32
    %c0_i32_1 = arith.constant 0 : i32
    return %c0_i32, %c0_i32_0 : i32, i32
  }
  func.func @transform_2(%arg0: i32) -> (i32, i32) {
    %c0_i32 = arith.constant 0 : i32
    %c0_i32_0 = arith.constant 0 : i32
    %c0_i32_1 = arith.constant 0 : i32
    return %c0_i32, %c0_i32_0 : i32, i32
  }
  func.func @transform_3(%arg0: i32) -> (i32, i32) {
    %c0_i32 = arith.constant 0 : i32
    %c0_i32_0 = arith.constant 0 : i32
    %c0_i32_1 = arith.constant 0 : i32
    return %c0_i32, %c0_i32_0 : i32, i32
  }
  func.func @transform_4(%arg0: i32) -> (i32, i32) {
    %c0_i32 = arith.constant 0 : i32
    %c0_i32_0 = arith.constant 0 : i32
    %c0_i32_1 = arith.constant 0 : i32
    return %c0_i32, %c0_i32_0 : i32, i32
  }
  func.func @transform_5(%arg0: i32) -> (i32, i32) {
    %c0_i32 = arith.constant 0 : i32
    %c0_i32_0 = arith.constant 0 : i32
    %c0_i32_1 = arith.constant 0 : i32
    return %c0_i32, %c0_i32_0 : i32, i32
  }
  func.func @transform_6(%arg0: i32) -> (i32, i32) {
    %c0_i32 = arith.constant 0 : i32
    %c0_i32_0 = arith.constant 0 : i32
    %c0_i32_1 = arith.constant 0 : i32
    return %c0_i32, %c0_i32_0 : i32, i32
  }
  func.func @transform_7(%arg0: i32) -> (i32, i32) {
    %c0_i32 = arith.constant 0 : i32
    %c0_i32_0 = arith.constant 0 : i32
    return %c0_i32, %arg0 : i32, i32
  }
}

</mosaic_0001>

<bundles_post_ra>
// kernel: lattice_rnn_forward.1
= control target key start
LH: loop header
LB: loop body
LE: loop exit
PB: predicated region body
PF: predicated region fallthrough
CT: control target
= control target key end

     0   :  { %vm50_vm0 = vcmask 261120   ;;  %vm148_vm1 = vcmask 523264   ;;  %s1003_s0 = inlined_call_operand.vmem [shape: f32[256,128], index: 0, kind: input, shape index: {}]   ;;  %s1004_s1 = inlined_call_operand.vmem [shape: f32[64,32], index: 1, kind: input, shape index: {}]   ;;  %s1005_s2 = inlined_call_operand.vmem [shape: f32[64,64], index: 2, kind: input, shape index: {}]   ;;  %s1006_s3 = inlined_call_operand.vmem [shape: f32[64,64], index: 3, kind: input, shape index: {}]   ;;  %s1007_s4 = inlined_call_operand.vmem [shape: f32[32,64], index: 4, kind: input, shape index: {}]   ;;  %s1008_s6 = inlined_call_operand.vmem [shape: f32[33,1], index: 6, kind: input, shape index: {}]   ;;  %s1009_s5 = inlined_call_operand.vmem [shape: f32[33,32], index: 5, kind: input, shape index: {}]   ;;  %s1010_s7 = inlined_call_operand.vmem [shape: f32[33,128], index: 7, kind: output, shape index: {}]  }
   0x1   :  { %v29_v0 = vld [vmem:[%s1003_s0 + $0x18] sm:$0xff]  ;;  %v28_v1 = vld [vmem:[%s1003_s0 + $0x10] sm:$0xff]  ;;  %v27_v2 = vld [vmem:[%s1003_s0 + $0x8] sm:$0xff] }
   0x2   :  { %636 = vtanh.f32 %v29_v0  ;;  %v26_v3 = vld [vmem:[%s1003_s0] sm:$0xff]  ;;  %v43_v9 = vld [vmem:[%s1004_s1 + $0x8] sm:$0xff]  ;;  %v44_v10 = vld [vmem:[%s1004_s1 + $0x10] sm:$0xff] }
   0x3   :  { %638 = vtanh.f32 %v28_v1  ;;  %v42_v8 = vld [vmem:[%s1004_s1] sm:$0xff]  ;;  %v45_v11 = vld [vmem:[%s1004_s1 + $0x18] sm:$0xff]  ;;  %v47_v13 = vld [vmem:[%s1004_s1 + $0x28] sm:$0xff] }
   0x4   :  { %640 = vtanh.f32 %v27_v2  ;;  %v46_v12 = vld [vmem:[%s1004_s1 + $0x20] sm:$0xff]  ;;  %v48_v14 = vld [vmem:[%s1004_s1 + $0x30] sm:$0xff]  ;;  %v49_v15 = vld [vmem:[%s1004_s1 + $0x38] sm:$0xff] }
   0x5   :  { %642 = vtanh.f32 %v26_v3  ;;  %v40_v23 = vld [vmem:[%s1003_s0 + $0x50] sm:$0xff]  ;;  %v41_v24 = vld [vmem:[%s1003_s0 + $0x58] sm:$0xff]  ;;  %v39_v25 = vld [vmem:[%s1003_s0 + $0x48] sm:$0xff] }
   0x6   :  { %v38_v29 = vld [vmem:[%s1003_s0 + $0x40] sm:$0xff]  ;;  %v37_v31 = vld [vmem:[%s1003_s0 + $0x38] sm:$0xff]  ;;  %v36_v33 = vld [vmem:[%s1003_s0 + $0x30] sm:$0xff] }
   0x7   :  { %v35_v35 = vld [vmem:[%s1003_s0 + $0x28] sm:$0xff]  ;;  %v34_v38 = vld [vmem:[%s1003_s0 + $0x20] sm:$0xff]  ;;  %v142_v50 = vld [vmem:[%s1005_s2 + $0x10] sm:$0xff] }
   0x8   :  { %v637_v4 = vpop.eup %636  ;;  %v140_v47 = vld [vmem:[%s1005_s2] sm:$0xff]  ;;  %v141_v49 = vld [vmem:[%s1005_s2 + $0x8] sm:$0xff]  ;;  %v143_v51 = vld [vmem:[%s1005_s2 + $0x18] sm:$0xff] }
   0x9   :  { %v639_v5 = vpop.eup %638  ;;  %87 = vmatpush.msra.mxu0 %v637_v4  ;;  %v144_v52 = vld [vmem:[%s1005_s2 + $0x20] sm:$0xff]  ;;  %v145_v53 = vld [vmem:[%s1005_s2 + $0x28] sm:$0xff]  ;;  %v146_v54 = vld [vmem:[%s1005_s2 + $0x30] sm:$0xff] }
   0xa   :  { %v641_v6 = vpop.eup %640  ;;  %v147_v55 = vld [vmem:[%s1005_s2 + $0x38] sm:$0xff]  ;;  %v138_v63 = vld [vmem:[%s1003_s0 + $0x90] sm:$0xff]  ;;  %v137_v1 = vld [vmem:[%s1003_s0 + $0x88] sm:$0xff] }
   0xb   :  { %88 = vmatpush.msra.mxu0 %v639_v5  ;;  %v643_v7 = vpop.eup %642  ;;  %v139_v0 = vld [vmem:[%s1003_s0 + $0x98] sm:$0xff]  ;;  %v136_v5 = vld [vmem:[%s1003_s0 + $0x80] sm:$0xff] }
   0xd   :  { %89 = vmatpush.msra.mxu0 %v641_v6 }
   0xf   :  { %90 = vmatpush.msra.mxu0 %v643_v7  ;;  %v135_v7 = vld [vmem:[%s1003_s0 + $0x78] sm:$0xff] }
  0x10   :  { %586 = vmatmul.msk.f32.vlgmr.msra.gmra.mxu0 %vm50_vm0, %v42_v8 }
  0x18   :  { %587 = vmatmul.msk.f32.gmra.mxu0 %vm50_vm0, %v43_v9  ;;  %v134_v9 = vld [vmem:[%s1003_s0 + $0x70] sm:$0xff] }
  0x20   :  { %588 = vmatmul.msk.f32.gmra.mxu0 %vm50_vm0, %v44_v10 }
  0x28   :  { %589 = vmatmul.msk.f32.gmra.mxu0 %vm50_vm0, %v45_v11  ;;  %v133_v11 = vld [vmem:[%s1003_s0 + $0x68] sm:$0xff] }
  0x30   :  { %590 = vmatmul.msk.f32.gmra.mxu0 %vm50_vm0, %v46_v12 }
  0x38   :  { %591 = vmatmul.msk.f32.gmra.mxu0 %vm50_vm0, %v47_v13 }
  0x40   :  { %592 = vmatmul.msk.f32.gmra.mxu0 %vm50_vm0, %v48_v14  ;;  %v132_v14 = vld [vmem:[%s1003_s0 + $0x60] sm:$0xff] }
  0x48   :  { %593 = vmatmul.msk.f32.gmra.mxu0 %vm50_vm0, %v49_v15 }
  0x8d   :  { %v92_v16 = vpop.f32.mrf.mxu0 }
  0x8e   :  { %v116_v42 = vadd.f32 %v92_v16, %v34_v38 }
  0x95   :  { %v95_v17 = vpop.f32.mrf.mxu0 }
  0x96   :  { %v117_v40 = vadd.f32 %v95_v17, %v35_v35 }
  0x9d   :  { %v98_v18 = vpop.f32.mrf.mxu0 }
  0x9e   :  { %v118_v37 = vadd.f32 %v98_v18, %v36_v33 }
  0xa5   :  { %v101_v19 = vpop.f32.mrf.mxu0 }
  0xa6   :  { %v119_v34 = vadd.f32 %v101_v19, %v37_v31  ;;  %v245_v31 = vld [vmem:[%s1006_s3 + $0x38] sm:$0xff] }
  0xad   :  { %v104_v20 = vpop.f32.mrf.mxu0 }
  0xae   :  { %v120_v32 = vadd.f32 %v104_v20, %v38_v29  ;;  %v243_v29 = vld [vmem:[%s1006_s3 + $0x28] sm:$0xff] }
  0xb5   :  { %v107_v21 = vpop.f32.mrf.mxu0 }
  0xb6   :  { %v121_v30 = vadd.f32 %v107_v21, %v39_v25  ;;  %v239_v25 = vld [vmem:[%s1006_s3 + $0x8] sm:$0xff] }
  0xbd   :  { %v110_v22 = vpop.f32.mrf.mxu0 }
  0xbe   :  { %v122_v27 = vadd.f32 %v110_v22, %v40_v23  ;;  %v238_v23 = vld [vmem:[%s1006_s3] sm:$0xff] }
  0xc5   :  { %v113_v26 = vpop.f32.mrf.mxu0 }
  0xc6   :  { %v123_v28 = vadd.f32 %v113_v26, %v41_v24  ;;  %v240_v26 = vld [vmem:[%s1006_s3 + $0x10] sm:$0xff] }
  0xc8   :  { %644 = vtanh.f32 %v123_v28  ;;  %v242_v28 = vld [vmem:[%s1006_s3 + $0x20] sm:$0xff] }
  0xc9   :  { %646 = vtanh.f32 %v122_v27  ;;  %v241_v27 = vld [vmem:[%s1006_s3 + $0x18] sm:$0xff] }
  0xca   :  { %648 = vtanh.f32 %v121_v30  ;;  %v244_v30 = vld [vmem:[%s1006_s3 + $0x30] sm:$0xff] }
  0xcb   :  { %650 = vtanh.f32 %v120_v32 }
  0xcc   :  { %652 = vtanh.f32 %v119_v34 }
  0xcd   :  { %654 = vtanh.f32 %v118_v37 }
  0xce   :  { %v645_v36 = vpop.eup %644  ;;  %656 = vtanh.f32 %v117_v40  ;;  %v237_v40 = vld [vmem:[%s1003_s0 + $0xd8] sm:$0xff] }
  0xcf   :  { %181 = vmatpush.msra.mxu1 %v645_v36  ;;  %v647_v39 = vpop.eup %646  ;;  %658 = vtanh.f32 %v116_v42 }
  0xd0   :  { %v649_v41 = vpop.eup %648 }
  0xd1   :  { %182 = vmatpush.msra.mxu1 %v647_v39  ;;  %v651_v43 = vpop.eup %650  ;;  %v236_v39 = vld [vmem:[%s1003_s0 + $0xd0] sm:$0xff] }
  0xd2   :  { %v653_v44 = vpop.eup %652 }
  0xd3   :  { %183 = vmatpush.msra.mxu1 %v649_v41  ;;  %v655_v45 = vpop.eup %654  ;;  %v235_v41 = vld [vmem:[%s1003_s0 + $0xc8] sm:$0xff] }
  0xd4   :  { %v657_v46 = vpop.eup %656 }
  0xd5   :  { %184 = vmatpush.msra.mxu1 %v651_v43  ;;  %v659_v48 = vpop.eup %658 }
  0xd7   :  { %185 = vmatpush.msra.mxu1 %v653_v44 }
  0xd9   :  { %186 = vmatpush.msra.mxu1 %v655_v45  ;;  %v234_v45 = vld [vmem:[%s1003_s0 + $0xc0] sm:$0xff] }
  0xdb   :  { %187 = vmatpush.msra.mxu1 %v657_v46 }
  0xdd   :  { %188 = vmatpush.msra.mxu1 %v659_v48 }
  0xde   :  { %594 = vmatmul.msk.f32.vlgmr.msra.gmra.mxu1 %vm148_vm1, %v140_v47  ;;  %v233_v47 = vld [vmem:[%s1003_s0 + $0xb8] sm:$0xff] }
  0xe6   :  { %595 = vmatmul.msk.f32.gmra.mxu1 %vm148_vm1, %v141_v49  ;;  %v232_v49 = vld [vmem:[%s1003_s0 + $0xb0] sm:$0xff] }
  0xee   :  { %596 = vmatmul.msk.f32.gmra.mxu1 %vm148_vm1, %v142_v50 }
  0xf6   :  { %597 = vmatmul.msk.f32.gmra.mxu1 %vm148_vm1, %v143_v51  ;;  %v231_v51 = vld [vmem:[%s1003_s0 + $0xa8] sm:$0xff] }
  0xfe   :  { %598 = vmatmul.msk.f32.gmra.mxu1 %vm148_vm1, %v144_v52 }
 0x106   :  { %599 = vmatmul.msk.f32.gmra.mxu1 %vm148_vm1, %v145_v53 }
 0x10e   :  { %600 = vmatmul.msk.f32.gmra.mxu1 %vm148_vm1, %v146_v54  ;;  %v230_v54 = vld [vmem:[%s1003_s0 + $0xa0] sm:$0xff] }
 0x116   :  { %601 = vmatmul.msk.f32.gmra.mxu1 %vm148_vm1, %v147_v55 }
 0x15b   :  { %v190_v56 = vpop.f32.mrf.mxu1 }
 0x15c   :  { %v214_v18 = vadd.f32 %v190_v56, %v132_v14 }
 0x163   :  { %v193_v57 = vpop.f32.mrf.mxu1 }
 0x164   :  { %v215_v16 = vadd.f32 %v193_v57, %v133_v11 }
 0x16b   :  { %v196_v58 = vpop.f32.mrf.mxu1 }
 0x16c   :  { %v216_v13 = vadd.f32 %v196_v58, %v134_v9  ;;  %v330_v9 = vld [vmem:[%s1003_s0 + $0xf8] sm:$0xff] }
 0x173   :  { %v199_v59 = vpop.f32.mrf.mxu1 }
 0x174   :  { %v217_v10 = vadd.f32 %v199_v59, %v135_v7  ;;  %v393_v7 = vld [vmem:[%s1008_s6 + $0x20] sm:$0x1] }
 0x17b   :  { %v202_v60 = vpop.f32.mrf.mxu1 }
 0x17c   :  { %v218_v8 = vadd.f32 %v202_v60, %v136_v5 }
 0x183   :  { %v205_v61 = vpop.f32.mrf.mxu1 }
 0x184   :  { %v219_v6 = vadd.f32 %v205_v61, %v137_v1 }
 0x18b   :  { %v208_v62 = vpop.f32.mrf.mxu1 }
 0x18c   :  { %v220_v3 = vadd.f32 %v208_v62, %v138_v63  ;;  %v332_v63 = vld [vmem:[%s1007_s4 + $0x8] sm:$0xff] }
 0x193   :  { %v211_v2 = vpop.f32.mrf.mxu1 }
 0x194   :  { %v221_v4 = vadd.f32 %v211_v2, %v139_v0  ;;  %v331_v0 = vld [vmem:[%s1007_s4] sm:$0xff]  ;;  %v333_v2 = vld [vmem:[%s1007_s4 + $0x10] sm:$0xff] }
 0x196   :  { %660 = vtanh.f32 %v221_v4 }
 0x197   :  { %662 = vtanh.f32 %v220_v3  ;;  %v334_v3 = vld [vmem:[%s1007_s4 + $0x18] sm:$0xff] }
 0x198   :  { %664 = vtanh.f32 %v219_v6  ;;  %v704_v6 = vmov 0  }
 0x199   :  { %666 = vtanh.f32 %v218_v8  ;;  %633 = vset.pattern.permute.xlu0 %v704_v6  ;;  %634 = vset.pattern.permute.xlu1 %v704_v6  ;;  %v329_v8 = vld [vmem:[%s1003_s0 + $0xf0] sm:$0xff] }
 0x19a   :  { %668 = vtanh.f32 %v217_v10  ;;  %416 = vperm.xlu0 %633, %v393_v7   ;;  %635 = vset.pattern.permute.xlu2 %v704_v6  ;;  %v327_v10 = vld [vmem:[%s1003_s0 + $0xe0] sm:$0xff] }
 0x19b   :  { %670 = vtanh.f32 %v216_v13 }
 0x19c   :  { %v661_v12 = vpop.eup %660  ;;  %672 = vtanh.f32 %v215_v16  ;;  %v389_v16 = vld [vmem:[%s1008_s6] sm:$0xff] }
 0x19d   :  { %278 = vmatpush.msra.mxu2 %v661_v12  ;;  %v663_v15 = vpop.eup %662  ;;  %674 = vtanh.f32 %v214_v18  ;;  %v328_v12 = vld [vmem:[%s1003_s0 + $0xe8] sm:$0xff] }
 0x19e   :  { %v665_v17 = vpop.eup %664 }
 0x19f   :  { %279 = vmatpush.msra.mxu2 %v663_v15  ;;  %v667_v19 = vpop.eup %666 }
 0x1a0   :  { %v669_v20 = vpop.eup %668 }
 0x1a1   :  { %280 = vmatpush.msra.mxu2 %v665_v17  ;;  %v671_v21 = vpop.eup %670 }
 0x1a2   :  { %v673_v22 = vpop.eup %672  ;;  %396 = vperm.xlu0 %633, %v389_v16  }
 0x1a3   :  { %281 = vmatpush.msra.mxu2 %v667_v19  ;;  %v675_v24 = vpop.eup %674 }
 0x1a5   :  { %282 = vmatpush.msra.mxu2 %v669_v20  ;;  %v390_v20 = vld [vmem:[%s1008_s6 + $0x8] sm:$0xff] }
 0x1a6   :  { %401 = vperm.xlu1 %634, %v390_v20  }
 0x1a7   :  { %283 = vmatpush.msra.mxu2 %v671_v21 }
 0x1a9   :  { %284 = vmatpush.msra.mxu2 %v673_v22 }
 0x1ab   :  { %285 = vmatpush.msra.mxu2 %v675_v24  ;;  %v384_v24 = vld [vmem:[%s1009_s5] sm:$0xff] }
 0x1ac   :  { %602 = vmatmul.msk.f32.vlgmr.msra.gmra.mxu2 %vm148_vm1, %v238_v23 }
 0x1b4   :  { %603 = vmatmul.msk.f32.gmra.mxu2 %vm148_vm1, %v239_v25  ;;  %v391_v25 = vld [vmem:[%s1008_s6 + $0x10] sm:$0xff] }
 0x1b5   :  { %406 = vperm.xlu1 %634, %v391_v25  }
 0x1bc   :  { %604 = vmatmul.msk.f32.gmra.mxu2 %vm148_vm1, %v240_v26  ;;  %v392_v26 = vld [vmem:[%s1008_s6 + $0x18] sm:$0xff] }
 0x1bd   :  { %411 = vperm.xlu2 %635, %v392_v26  }
 0x1c4   :  { %605 = vmatmul.msk.f32.gmra.mxu2 %vm148_vm1, %v241_v27  ;;  %v385_v27 = vld [vmem:[%s1009_s5 + $0x8] sm:$0xff] }
 0x1cc   :  { %606 = vmatmul.msk.f32.gmra.mxu2 %vm148_vm1, %v242_v28  ;;  %v386_v28 = vld [vmem:[%s1009_s5 + $0x10] sm:$0xff] }
 0x1d4   :  { %607 = vmatmul.msk.f32.gmra.mxu2 %vm148_vm1, %v243_v29  ;;  %v387_v29 = vld [vmem:[%s1009_s5 + $0x18] sm:$0xff] }
 0x1dc   :  { %608 = vmatmul.msk.f32.gmra.mxu2 %vm148_vm1, %v244_v30  ;;  %v388_v30 = vld [vmem:[%s1009_s5 + $0x20] sm:$0x1] }
 0x1e4   :  { %609 = vmatmul.msk.f32.gmra.mxu2 %vm148_vm1, %v245_v31 }
 0x20c   :  { %v417_v31 = vpop.permute.xlu0 %416 }
 0x22f   :  { %v287_v32 = vpop.f32.mrf.mxu2 }
 0x230   :  { %v311_v58 = vadd.f32 %v287_v32, %v230_v54  ;;  %v397_v32 = vpop.permute.xlu0 %396 }
 0x237   :  { %v290_v33 = vpop.f32.mrf.mxu2 }
 0x238   :  { %v312_v56 = vadd.f32 %v290_v33, %v231_v51 }
 0x23f   :  { %v293_v34 = vpop.f32.mrf.mxu2 }
 0x240   :  { %v313_v53 = vadd.f32 %v293_v34, %v232_v49  ;;  %v466_v49 = vlaneseq }
 0x242   :  { %v467_v51 = vshrl.u32 %v466_v49, 7 }
 0x244   :  { %v471_v54 = vadd.s32 32, %v467_v51 }
 0x246   :  { %vm476_vm4 = vcmp.eq.s32.totalorder %v471_v54, 32 }
 0x247   :  { %v296_v35 = vpop.f32.mrf.mxu2 }
 0x248   :  { %v314_v50 = vadd.f32 %v296_v35, %v233_v47  ;;  %v402_v35 = vpop.permute.xlu1 %401 }
 0x24f   :  { %v299_v36 = vpop.f32.mrf.mxu2 }
 0x250   :  { %v315_v48 = vadd.f32 %v299_v36, %v234_v45 }
 0x257   :  { %v302_v37 = vpop.f32.mrf.mxu2 }
 0x258   :  { %v316_v46 = vadd.f32 %v302_v37, %v235_v41  ;;  %v412_v41 = vpop.permute.xlu2 %411 }
 0x25f   :  { %v305_v38 = vpop.f32.mrf.mxu2 }
 0x260   :  { %v317_v43 = vadd.f32 %v305_v38, %v236_v39  ;;  %v407_v38 = vpop.permute.xlu1 %406 }
 0x267   :  { %v308_v42 = vpop.f32.mrf.mxu2 }
 0x268   :  { %v318_v44 = vadd.f32 %v308_v42, %v237_v40 }
 0x26a   :  { %676 = vtanh.f32 %v318_v44 }
 0x26b   :  { %678 = vtanh.f32 %v317_v43 }
 0x26c   :  { %680 = vtanh.f32 %v316_v46 }
 0x26d   :  { %682 = vtanh.f32 %v315_v48 }
 0x26e   :  { %684 = vtanh.f32 %v314_v50 }
 0x26f   :  { %686 = vtanh.f32 %v313_v53 }
 0x270   :  { %v677_v52 = vpop.eup %676  ;;  %688 = vtanh.f32 %v312_v56 }
 0x271   :  { %355 = vmatpush.msrb.mxu0 %v677_v52  ;;  %624 = vmatpush.msra.mxu3 %v677_v52  ;;  %v679_v55 = vpop.eup %678  ;;  %690 = vtanh.f32 %v311_v58 }
 0x272   :  { %v681_v57 = vpop.eup %680 }
 0x273   :  { %356 = vmatpush.msrb.mxu0 %v679_v55  ;;  %625 = vmatpush.msra.mxu3 %v679_v55  ;;  %v683_v59 = vpop.eup %682 }
 0x274   :  { %v685_v60 = vpop.eup %684 }
 0x275   :  { %357 = vmatpush.msrb.mxu0 %v681_v57  ;;  %626 = vmatpush.msra.mxu3 %v681_v57  ;;  %v687_v61 = vpop.eup %686 }
 0x276   :  { %v689_v62 = vpop.eup %688 }
 0x277   :  { %358 = vmatpush.msrb.mxu0 %v683_v59  ;;  %627 = vmatpush.msra.mxu3 %v683_v59  ;;  %v691_v1 = vpop.eup %690 }
 0x279   :  { %359 = vmatpush.msrb.mxu0 %v685_v60  ;;  %628 = vmatpush.msra.mxu3 %v685_v60 }
 0x27b   :  { %360 = vmatpush.msrb.mxu0 %v687_v61  ;;  %629 = vmatpush.msra.mxu3 %v687_v61 }
 0x27d   :  { %361 = vmatpush.msrb.mxu0 %v689_v62  ;;  %630 = vmatpush.msra.mxu3 %v689_v62 }
 0x27f   :  { %362 = vmatpush.msrb.mxu0 %v691_v1  ;;  %631 = vmatpush.msra.mxu3 %v691_v1 }
 0x280   :  { %611 = vmatmul.msk.f32.vlgmr.msra.gmra.mxu3 %vm148_vm1, %v332_v63  ;;  %610 = vmatmul.msk.f32.vlgmr.msrb.gmra.mxu0 %vm148_vm1, %v331_v0 }
 0x288   :  { %612 = vmatmul.msk.f32.gmra.mxu3 %vm148_vm1, %v333_v2 }
 0x290   :  { %613 = vmatmul.msk.f32.gmra.mxu3 %vm148_vm1, %v334_v3 }
 0x2fd   :  { %v364_v11 = vpop.f32.mrf.mxu0 }
 0x2fe   :  { %v376_v17 = vadd.f32 %v364_v11, %v327_v10 }
 0x303   :  { %v367_v4 = vpop.f32.mrf.mxu3 }
 0x304   :  { %v377_v18 = vadd.f32 %v367_v4, %v328_v12 }
 0x30b   :  { %v370_v5 = vpop.f32.mrf.mxu3 }
 0x30c   :  { %v378_v14 = vadd.f32 %v370_v5, %v329_v8 }
 0x313   :  { %v373_v13 = vpop.f32.mrf.mxu3 }
 0x314   :  { %v379_v15 = vadd.f32 %v373_v13, %v330_v9 }
 0x316   :  { %692 = vtanh.f32 %v379_v15 }
 0x317   :  { %694 = vtanh.f32 %v378_v14 }
 0x318   :  { %696 = vtanh.f32 %v376_v17 }
 0x319   :  { %698 = vtanh.f32 %v377_v18 }
 0x31c   :  { %v693_v19 = vpop.eup %692 }
 0x31d   :  { %446 = vmatpush.msrb.mxu3 %v693_v19  ;;  %v695_v21 = vpop.eup %694 }
 0x31e   :  { %v697_v22 = vpop.eup %696 }
 0x31f   :  { %447 = vmatpush.msrb.mxu3 %v695_v21  ;;  %v699_v23 = vpop.eup %698 }
 0x321   :  { %448 = vmatpush.msrb.mxu3 %v699_v23 }
 0x323   :  { %449 = vmatpush.msrb.mxu3 %v697_v22 }
 0x324   :  { %614 = vmatmul.msk.f32.vlgmr.msrb.gmra.mxu3 %vm50_vm0, %v384_v24 }
 0x32c   :  { %615 = vmatmul.msk.f32.gmra.mxu3 %vm50_vm0, %v385_v27 }
 0x334   :  { %616 = vmatmul.msk.f32.gmra.mxu3 %vm50_vm0, %v386_v28 }
 0x33c   :  { %617 = vmatmul.msk.f32.gmra.mxu3 %vm50_vm0, %v387_v29 }
 0x344   :  { %618 = vmatmul.msk.f32.gmra.mxu3 %vm50_vm0, %v388_v30 }
 0x3a7   :  { %v451_v33 = vpop.f32.mrf.mxu3 }
 0x3a8   :  { %v452_v34 = vadd.f32 %v451_v33, %v397_v32 }
 0x3aa   :  { %577 = vst [vmem:[%s1010_s7] sm:$0xff] %v452_v34 }
 0x3af   :  { %v454_v36 = vpop.f32.mrf.mxu3 }
 0x3b0   :  { %v455_v37 = vadd.f32 %v454_v36, %v402_v35 }
 0x3b2   :  { %578 = vst [vmem:[%s1010_s7 + $0x8] sm:$0xff] %v455_v37 }
 0x3b7   :  { %v457_v39 = vpop.f32.mrf.mxu3 }
 0x3b8   :  { %v458_v40 = vadd.f32 %v457_v39, %v407_v38 }
 0x3ba   :  { %579 = vst [vmem:[%s1010_s7 + $0x10] sm:$0xff] %v458_v40 }
 0x3bf   :  { %v460_v42 = vpop.f32.mrf.mxu3 }
 0x3c0   :  { %v461_v43 = vadd.f32 %v460_v42, %v412_v41 }
 0x3c2   :  { %580 = vst [vmem:[%s1010_s7 + $0x18] sm:$0xff] %v461_v43 }
 0x3c7   :  { %v463_v44 = vpop.f32.mrf.mxu3 }
 0x3c8   :  { %v464_v45 = vadd.f32 %v463_v44, %v417_v31 }
 0x3ca   :  { %v623_v46 = vmul.f32 -1.442695, %v464_v45 }
 0x3cc   :  { %700 = vpow2.f32 %v623_v46 }
 0x3d2   :  { %v701_v47 = vpop.eup %700 }
 0x3d3   :  { %v496_v48 = vadd.f32 1.0, %v701_v47 }
 0x3d5   :  { %702 = vrcp.f32 %v496_v48  ;;  %v568_v55 = vand.u32 2147483648, %v496_v48  ;;  %v566_v57 = vand.u32 2147483647, %v496_v48  ;;  %vm562_vm3 = vweird.f32 %v496_v48 }
 0x3d7   :  { %v569_v59 = vor.u32 1.1754944e-38, %v568_v55  ;;  %vm567_vm6 = vcmp.eq.f32.partialorder %v566_v57, 8.507059e+37 }
 0x3db   :  { %v703_v50 = vpop.eup %702 }
 0x3dc   :  { %v558_v52 = vmul.f32 %v703_v50, %v496_v48  ;;  %vm563_vm2 = vweird.f32 %v703_v50 }
 0x3dd   :  { %vm564_vm5 = vmor %vm562_vm3, %vm563_vm2 }
 0x3de   :  { %v559_v53 = vsub.f32 1.0, %v558_v52 }
 0x3e0   :  { %v560_v56 = vmul.f32 %v703_v50, %v559_v53 }
 0x3e2   :  { %v561_v58 = vadd.f32 %v703_v50, %v560_v56 }
 0x3e4   :  { %v565_v60 = vsel %vm564_vm5, %v703_v50, %v561_v58 }
 0x3e5   :  { %v570_v61 = vsel %vm567_vm6, %v569_v59, %v565_v60 }
 0x3e6   :  { %v576_v62 = vsel %vm476_vm4, %v570_v61, %v464_v45 }
 0x3e7   :  { %581 = vst [vmem:[%s1010_s7 + $0x20] sm:$0x1] %v576_v62 }

</bundles_post_ra>
